<compile_context>
chip_gen: v5e
topology: v5e:2x2
jax: 0.10.0
libtpu: 0.0.40
codegen_flags: <defaults>
</compile_context>

<pallas_src>
import functools

import jax
import jax.numpy as jnp
from jax.experimental import pallas as pl
from jax.experimental.pallas import tpu as pltpu


def _round_up(x, m):
    return (x + m - 1) // m * m


def _pad2(a, rows, cols):
    pr, pc = rows - a.shape[0], cols - a.shape[1]
    if pr or pc:
        a = jnp.pad(a, ((0, pr), (0, pc)))
    return a


def policy_net_kernel(x_ref, w1_ref, b1_ref, w2_ref, b2_ref, w3_ref, b3_ref, out_ref):
    # In-kernel f32 -> bf16 cast of the obs tile (VPU work, hidden under the MXU).
    x = x_ref[...].astype(jnp.bfloat16)
    # Layer 1: Linear (bf16 in, f32 acc) + bias + ReLU, recast to bf16 for next MXU pass.
    h1 = jnp.dot(x, w1_ref[...], preferred_element_type=jnp.float32)
    h1 = jnp.maximum(h1 + b1_ref[...], 0.0).astype(jnp.bfloat16)
    # Layer 2: Linear + bias + ReLU.
    h2 = jnp.dot(h1, w2_ref[...], preferred_element_type=jnp.float32)
    h2 = jnp.maximum(h2 + b2_ref[...], 0.0).astype(jnp.bfloat16)
    # Output head: Linear + bias (no activation); stored bf16, lane-dense (Ap = 128k).
    out = jnp.dot(h2, w3_ref[...], preferred_element_type=jnp.float32) + b3_ref[...]
    out_ref[...] = out.astype(out_ref.dtype)


def prepare_params(params):
    """One-time pad + cast of the six weight/bias tensors (call OUTSIDE the hot loop).

    Returns (prepared_dict, action_dim).  Padded columns/rows are zero so they
    contribute exactly 0 through Linear+ReLU and are sliced off after the kernel.
    """
    w1, b1 = params["w1"], params["b1"]
    w2, b2 = params["w2"], params["b2"]
    w3, b3 = params["w3"], params["b3"]
    S, H = w1.shape
    A = w3.shape[1]
    Hp = _round_up(H, 128)
    Ap = _round_up(A, 128)
    prepared = {
        "w1": _pad2(w1, S, Hp).astype(jnp.bfloat16),   # (S,  Hp) - K stays un-padded
        "b1": _pad2(b1, 1, Hp).astype(jnp.float32),
        "w2": _pad2(w2, Hp, Hp).astype(jnp.bfloat16),
        "b2": _pad2(b2, 1, Hp).astype(jnp.float32),
        "w3": _pad2(w3, Hp, Ap).astype(jnp.bfloat16),
        "b3": _pad2(b3, 1, Ap).astype(jnp.float32),
    }
    return prepared, A


def _batch_tile(B, batch_tile):
    """Pick the batch tile (static shapes -> plain Python arithmetic)."""
    if B <= 16:
        return B                                   # single tiny block, full batch dim
    tb = min(_round_up(batch_tile, 16), _round_up(B, 16))
    if -(-B // tb) < 2 and B >= 32:
        # Guarantee >= 2 grid steps so v7x's two TensorCores both get work.
        tb = _round_up(-(-B // 2), 16)
    return tb


@functools.partial(jax.jit, static_argnames=("action_dim", "batch_tile"))
def policy_net_forward(obs, prepared, *, action_dim, batch_tile=2048):
    """obs: (B, state_dim) f32; prepared: output of prepare_params()."""
    B, S = obs.shape
    Hp = prepared["w1"].shape[1]
    Ap = prepared["w3"].shape[1]
    TB = _batch_tile(B, batch_tile)
    grid_steps = -(-B // TB)

    out_p = pl.pallas_call(
        policy_net_kernel,
        out_shape=jax.ShapeDtypeStruct((B, Ap), jnp.bfloat16),
        grid_spec=pltpu.PrefetchScalarGridSpec(
            num_scalar_prefetch=0,
            grid=(grid_steps,),
            in_specs=[
                pl.BlockSpec((TB, S), lambda i: (i, 0)),    # obs: tiled over batch, f32
                pl.BlockSpec((S, Hp), lambda i: (0, 0)),    # w1: resident
                pl.BlockSpec((1, Hp), lambda i: (0, 0)),    # b1: resident
                pl.BlockSpec((Hp, Hp), lambda i: (0, 0)),   # w2: resident
                pl.BlockSpec((1, Hp), lambda i: (0, 0)),    # b2: resident
                pl.BlockSpec((Hp, Ap), lambda i: (0, 0)),   # w3: resident
                pl.BlockSpec((1, Ap), lambda i: (0, 0)),    # b3: resident
            ],
            out_specs=pl.BlockSpec((TB, Ap), lambda i: (i, 0)),
        ),
        compiler_params=pltpu.CompilerParams(
            # Batch axis is embarrassingly parallel -> both TensorCores on v7x.
            dimension_semantics=("parallel",),
            vmem_limit_bytes=32 * 1024 * 1024,
        ),
    )(obs, prepared["w1"], prepared["b1"], prepared["w2"], prepared["b2"],
      prepared["w3"], prepared["b3"])

    # Narrow slice (B, A) of the lane-padded bf16 output, cast back to f32.
    return out_p[:, :action_dim].astype(jnp.float32)


def init_policy_net_params(key, state_dim, action_dim, hidden_dim=256):
    """Deterministic init mimicking nn.Linear default: U(-1/sqrt(fan_in), 1/sqrt(fan_in))."""
    def linear(k, fan_in, fan_out):
        kw, kb = jax.random.split(k)
        bound = 1.0 / jnp.sqrt(fan_in)
        w = jax.random.uniform(kw, (fan_in, fan_out), jnp.float32, -bound, bound)
        b = jax.random.uniform(kb, (1, fan_out), jnp.float32, -bound, bound)
        return w, b

    k1, k2, k3 = jax.random.split(key, 3)
    w1, b1 = linear(k1, state_dim, hidden_dim)
    w2, b2 = linear(k2, hidden_dim, hidden_dim)
    w3, b3 = linear(k3, hidden_dim, action_dim)
    return {"w1": w1, "b1": b1, "w2": w2, "b2": b2, "w3": w3, "b3": b3}


def policy_net_ref_f32(obs, p):
    """Pure f32 reference (matches the PyTorch module numerics)."""
    h1 = jnp.maximum(obs @ p["w1"] + p["b1"], 0.0)
    h2 = jnp.maximum(h1 @ p["w2"] + p["b2"], 0.0)
    return h2 @ p["w3"] + p["b3"]


def policy_net_ref_bf16(obs, p):
    """Reference following the same bf16-in / f32-acc / bf16-out path as the kernel."""
    bf = jnp.bfloat16
    h1 = jnp.dot(obs.astype(bf), p["w1"].astype(bf), preferred_element_type=jnp.float32)
    h1 = jnp.maximum(h1 + p["b1"], 0.0).astype(bf)
    h2 = jnp.dot(h1, p["w2"].astype(bf), preferred_element_type=jnp.float32)
    h2 = jnp.maximum(h2 + p["b2"], 0.0).astype(bf)
    out = jnp.dot(h2, p["w3"].astype(bf), preferred_element_type=jnp.float32) + p["b3"]
    return out.astype(bf).astype(jnp.float32)


if __name__ == "__main__":
    key = jax.random.PRNGKey(0)
    batch, state_dim, action_dim, hidden_dim = 8, 16, 4, 32

    k_params, k_obs = jax.random.split(key)
    params = init_policy_net_params(k_params, state_dim, action_dim, hidden_dim)
    obs = jax.random.normal(k_obs, (batch, state_dim), jnp.float32)

    prepared, a_dim = prepare_params(params)
    out = policy_net_forward(obs, prepared, action_dim=a_dim)
    out = jax.block_until_ready(out)

    assert out.shape == (batch, action_dim)
    # Exact-path check (same bf16-in / f32-acc / bf16-out math as the kernel).
    ref_bf16 = policy_net_ref_bf16(obs, params)
    assert jnp.allclose(out, ref_bf16, atol=5e-3, rtol=5e-3)
    # Loose check against full-f32 PyTorch-equivalent reference (bf16 quantization).
    ref_f32 = policy_net_ref_f32(obs, params)
    assert jnp.allclose(out, ref_f32, atol=3e-2, rtol=3e-2)

    print("KERNEL_OK")
</pallas_src>

<mosaic_0001>
module attributes {stable_mosaic.version = 11 : i64} {
  func.func @policy_net_kernel(%arg0: i32, %arg1: memref<8x16xf32, #tpu.memory_space<vmem>>, %arg2: memref<16x128xbf16, #tpu.memory_space<vmem>>, %arg3: memref<1x128xf32, #tpu.memory_space<vmem>>, %arg4: memref<128x128xbf16, #tpu.memory_space<vmem>>, %arg5: memref<1x128xf32, #tpu.memory_space<vmem>>, %arg6: memref<128x128xbf16, #tpu.memory_space<vmem>>, %arg7: memref<1x128xf32, #tpu.memory_space<vmem>>, %arg8: memref<8x128xbf16, #tpu.memory_space<vmem>>) attributes {dimension_semantics = [#tpu.dimension_semantics<parallel>], iteration_bounds = array<i64: 1>, scalar_prefetch = 0 : i64, scratch_operands = 0 : i64, tpu.core_type = #tpu.core_type<tc>, window_params = [{transform_indices = @transform_0, window_bounds = array<i64: 8, 16>}, {pipeline_mode = #tpu.pipeline_mode<synchronous>, transform_indices = @transform_1, window_bounds = array<i64: 16, 128>}, {pipeline_mode = #tpu.pipeline_mode<synchronous>, transform_indices = @transform_2, window_bounds = array<i64: 1, 128>}, {pipeline_mode = #tpu.pipeline_mode<synchronous>, transform_indices = @transform_3, window_bounds = array<i64: 128, 128>}, {pipeline_mode = #tpu.pipeline_mode<synchronous>, transform_indices = @transform_4, window_bounds = array<i64: 1, 128>}, {pipeline_mode = #tpu.pipeline_mode<synchronous>, transform_indices = @transform_5, window_bounds = array<i64: 128, 128>}, {pipeline_mode = #tpu.pipeline_mode<synchronous>, transform_indices = @transform_6, window_bounds = array<i64: 1, 128>}, {transform_indices = @transform_7, window_bounds = array<i64: 8, 128>}]} {
    %c0 = arith.constant 0 : index
    %c0_0 = arith.constant 0 : index
    %0 = vector.load %arg1[%c0, %c0_0] : memref<8x16xf32, #tpu.memory_space<vmem>>, vector<8x16xf32>
    %1 = arith.truncf %0 : vector<8x16xf32> to vector<8x16xbf16>
    %c0_1 = arith.constant 0 : index
    %c0_2 = arith.constant 0 : index
    %2 = vector.load %arg2[%c0_1, %c0_2] : memref<16x128xbf16, #tpu.memory_space<vmem>>, vector<16x128xbf16>
    %cst = arith.constant dense<0.000000e+00> : vector<8x128xf32>
    %3 = tpu.matmul %1, %2, %cst {dimension_numbers = #tpu.dot_dimension_numbers<[1], [0], [0], [1], [0, 0, 1, 1], [], []>} : vector<8x16xbf16>, vector<16x128xbf16>, vector<8x128xf32> -> vector<8x128xf32>
    %c0_3 = arith.constant 0 : index
    %c0_4 = arith.constant 0 : index
    %4 = vector.load %arg3[%c0_3, %c0_4] : memref<1x128xf32, #tpu.memory_space<vmem>>, vector<1x128xf32>
    %5 = vector.broadcast %4 : vector<1x128xf32> to vector<8x128xf32>
    %6 = arith.addf %3, %5 : vector<8x128xf32>
    %cst_5 = arith.constant 0.000000e+00 : f32
    %7 = vector.broadcast %cst_5 : f32 to vector<8x128xf32>
    %8 = arith.maximumf %6, %7 : vector<8x128xf32>
    %9 = arith.truncf %8 : vector<8x128xf32> to vector<8x128xbf16>
    %c0_6 = arith.constant 0 : index
    %c0_7 = arith.constant 0 : index
    %10 = vector.load %arg4[%c0_6, %c0_7] : memref<128x128xbf16, #tpu.memory_space<vmem>>, vector<128x128xbf16>
    %cst_8 = arith.constant dense<0.000000e+00> : vector<8x128xf32>
    %11 = tpu.matmul %9, %10, %cst_8 {dimension_numbers = #tpu.dot_dimension_numbers<[1], [0], [0], [1], [0, 0, 1, 1], [], []>} : vector<8x128xbf16>, vector<128x128xbf16>, vector<8x128xf32> -> vector<8x128xf32>
    %c0_9 = arith.constant 0 : index
    %c0_10 = arith.constant 0 : index
    %12 = vector.load %arg5[%c0_9, %c0_10] : memref<1x128xf32, #tpu.memory_space<vmem>>, vector<1x128xf32>
    %13 = vector.broadcast %12 : vector<1x128xf32> to vector<8x128xf32>
    %14 = arith.addf %11, %13 : vector<8x128xf32>
    %cst_11 = arith.constant 0.000000e+00 : f32
    %15 = vector.broadcast %cst_11 : f32 to vector<8x128xf32>
    %16 = arith.maximumf %14, %15 : vector<8x128xf32>
    %17 = arith.truncf %16 : vector<8x128xf32> to vector<8x128xbf16>
    %c0_12 = arith.constant 0 : index
    %c0_13 = arith.constant 0 : index
    %18 = vector.load %arg6[%c0_12, %c0_13] : memref<128x128xbf16, #tpu.memory_space<vmem>>, vector<128x128xbf16>
    %cst_14 = arith.constant dense<0.000000e+00> : vector<8x128xf32>
    %19 = tpu.matmul %17, %18, %cst_14 {dimension_numbers = #tpu.dot_dimension_numbers<[1], [0], [0], [1], [0, 0, 1, 1], [], []>} : vector<8x128xbf16>, vector<128x128xbf16>, vector<8x128xf32> -> vector<8x128xf32>
    %c0_15 = arith.constant 0 : index
    %c0_16 = arith.constant 0 : index
    %20 = vector.load %arg7[%c0_15, %c0_16] : memref<1x128xf32, #tpu.memory_space<vmem>>, vector<1x128xf32>
    %21 = vector.broadcast %20 : vector<1x128xf32> to vector<8x128xf32>
    %22 = arith.addf %19, %21 : vector<8x128xf32>
    %23 = arith.truncf %22 : vector<8x128xf32> to vector<8x128xbf16>
    %c0_17 = arith.constant 0 : index
    %c0_18 = arith.constant 0 : index
    %24 = vector.load %arg8[%c0_17, %c0_18] : memref<8x128xbf16, #tpu.memory_space<vmem>>, vector<8x128xbf16>
    tpu.vector_store %arg8[%c0_17, %c0_18], %23 {strides = array<i32>} : memref<8x128xbf16, #tpu.memory_space<vmem>>, vector<8x128xbf16>,
    return
  }
  func.func @transform_0(%arg0: i32) -> (i32, i32) {
    %c0_i32 = arith.constant 0 : i32
    %c0_i32_0 = arith.constant 0 : i32
    return %arg0, %c0_i32 : i32, i32
  }
  func.func @transform_1(%arg0: i32) -> (i32, i32) {
    %c0_i32 = arith.constant 0 : i32
    %c0_i32_0 = arith.constant 0 : i32
    %c0_i32_1 = arith.constant 0 : i32
    return %c0_i32, %c0_i32_0 : i32, i32
  }
  func.func @transform_2(%arg0: i32) -> (i32, i32) {
    %c0_i32 = arith.constant 0 : i32
    %c0_i32_0 = arith.constant 0 : i32
    %c0_i32_1 = arith.constant 0 : i32
    return %c0_i32, %c0_i32_0 : i32, i32
  }
  func.func @transform_3(%arg0: i32) -> (i32, i32) {
    %c0_i32 = arith.constant 0 : i32
    %c0_i32_0 = arith.constant 0 : i32
    %c0_i32_1 = arith.constant 0 : i32
    return %c0_i32, %c0_i32_0 : i32, i32
  }
  func.func @transform_4(%arg0: i32) -> (i32, i32) {
    %c0_i32 = arith.constant 0 : i32
    %c0_i32_0 = arith.constant 0 : i32
    %c0_i32_1 = arith.constant 0 : i32
    return %c0_i32, %c0_i32_0 : i32, i32
  }
  func.func @transform_5(%arg0: i32) -> (i32, i32) {
    %c0_i32 = arith.constant 0 : i32
    %c0_i32_0 = arith.constant 0 : i32
    %c0_i32_1 = arith.constant 0 : i32
    return %c0_i32, %c0_i32_0 : i32, i32
  }
  func.func @transform_6(%arg0: i32) -> (i32, i32) {
    %c0_i32 = arith.constant 0 : i32
    %c0_i32_0 = arith.constant 0 : i32
    %c0_i32_1 = arith.constant 0 : i32
    return %c0_i32, %c0_i32_0 : i32, i32
  }
  func.func @transform_7(%arg0: i32) -> (i32, i32) {
    %c0_i32 = arith.constant 0 : i32
    %c0_i32_0 = arith.constant 0 : i32
    return %arg0, %c0_i32 : i32, i32
  }
}

</mosaic_0001>

<bundles_post_ra>
// kernel: policy_net_forward.1
= control target key start
LH: loop header
LB: loop body
LE: loop exit
PB: predicated region body
PF: predicated region fallthrough
CT: control target
= control target key end

     0   :  { %12 = vsyncpa [#allocation3], 0  ;;  %s600_s0 = inlined_call_operand.hbm [shape: f32[8,16], index: 0, kind: input, shape index: {}]   ;;  %s601_s1 = inlined_call_operand.hbm [shape: bf16[16,128], index: 1, kind: input, shape index: {}]   ;;  %s602_s2 = inlined_call_operand.hbm [shape: f32[1,128], index: 2, kind: input, shape index: {}]   ;;  %s603_s3 = inlined_call_operand.hbm [shape: bf16[128,128], index: 3, kind: input, shape index: {}]   ;;  %s604_s4 = inlined_call_operand.vmem [shape: f32[1,128], index: 4, kind: input, shape index: {}]   ;;  %s605_s5 = inlined_call_operand.hbm [shape: bf16[128,128], index: 5, kind: input, shape index: {}]   ;;  %s606_s6 = inlined_call_operand.vmem [shape: f32[1,128], index: 6, kind: input, shape index: {}]   ;;  %s607_s7 = inlined_call_operand.vmem [shape: bf16[8,128], index: 7, kind: output, shape index: {}]  }
   0x1   :  { %13 = vsyncpa [#allocation5], 0  ;;  %s30_s26 = sshll.u32 %s601_s1, 4  ;;  %s31_s26 = int_to_ptr.hbm [resolvable:$true] %s30_s26 }
   0x2   :  { %14 = vsyncpa [#allocation8], 0  ;;  %s529_s27 = smov [#allocation4]   ;;  %s54_s8 = sshll.u32 %s603_s3, 4  ;;  %s55_s8 = int_to_ptr.hbm [resolvable:$true] %s54_s8 }
   0x3   :  { %s32_s28 = sshll.u32 %s529_s27, 4  ;;  %s530_s9 = smov 64   ;;  %s33_s28 = int_to_ptr.vmem [resolvable:$true] %s32_s28 }
   0x4   :  { %s531_s10 = smov 4   ;;  %s532_s11 = smov [#allocation7]  }
   0x5   :  { %38 = dma.hbm_to_vmem [thread:$0]  %s31_s26, 128, %s33_s28, [#allocation5], %s530_s9, %s530_s9, %s531_s10  }
   0x6   :  { %s56_s12 = sshll.u32 %s532_s11, 4  ;;  %s20_s15 = sshll.u32 %s600_s0, 4  ;;  %s57_s12 = int_to_ptr.vmem [resolvable:$true] %s56_s12  ;;  %s21_s15 = int_to_ptr.hbm [resolvable:$true] %s20_s15 }
   0x7   :  { %62 = dma.hbm_to_vmem [thread:$0]  %s55_s8, 1024, %s57_s12, [#allocation8], %s530_s9, %s530_s9, %s531_s10  }
   0x8   :  { %s44_s17 = sshll.u32 %s602_s2, 4  ;;  %s533_s18 = smov [#allocation2]   ;;  %s45_s17 = int_to_ptr.hbm [resolvable:$true] %s44_s17 }
   0x9   :  { %s22_s19 = sshll.u32 %s533_s18, 4  ;;  %s534_s3 = smov [#allocation6]   ;;  %s23_s19 = int_to_ptr.vmem [resolvable:$true] %s22_s19 }
   0xa   :  { %25 = dma.hbm_to_vmem [thread:$0]  %s21_s15, 128, %s23_s19, [#allocation3]  }
   0xb   :  { %s46_s20 = sshll.u32 %s534_s3, 4  ;;  %s69_s23 = sshll.u32 %s605_s5, 4  ;;  %s47_s20 = int_to_ptr.vmem [resolvable:$true] %s46_s20  ;;  %s70_s23 = int_to_ptr.hbm [resolvable:$true] %s69_s23 }
   0xc   :  { %49 = dma.hbm_to_vmem [thread:$0]  %s45_s17, 16, %s47_s20, [#allocation5]  }
   0xd   :  { %s535_s0 = smov [#allocation9]  }
   0xe   :  { %s71_s24 = sshll.u32 %s535_s0, 4  ;;  %s72_s24 = int_to_ptr.vmem [resolvable:$true] %s71_s24 }
   0xf   :  { %77 = dma.hbm_to_vmem [thread:$0]  %s70_s23, 1024, %s72_s24, [#allocation8], %s530_s9, %s530_s9, %s531_s10  }
  0x10   :  { %523 = dma.done.wait [#allocation3], 128  }
  0x11   :  { %524 = vsyncadd [#allocation3], 4294967168 }
  0x12   :  { %525 = dma.done.wait [#allocation5], 144  }
  0x13   :  { %526 = vsyncadd [#allocation5], 4294967152 }
  0x14   :  { %527 = dma.done.wait [#allocation8], 2048  }
  0x15   :  { %528 = vsyncadd [#allocation8], 4294965248  ;;  %v376_v0 = vld [vmem:[#allocation4] sm:$0xff]  ;;  %v101_v1 = vld [vmem:[#allocation2] sm:$0xff]  ;;  %vm115_vm0 = vcmask 130048  }
  0x16   :  { %v384_v2 = vld [vmem:[#allocation7 + $0x38] sm:$0xff]  ;;  %v102_v3 = vpack.c.bf16 %v101_v1, %v101_v1  ;;  %126 = vmatpush.bf16.msra.mxu0 %v376_v0  ;;  %v383_v4 = vld [vmem:[#allocation7 + $0x30] sm:$0xff]  ;;  %v382_v5 = vld [vmem:[#allocation7 + $0x28] sm:$0xff] }
  0x17   :  { %202 = vmatpush.bf16.msra.mxu1 %v384_v2  ;;  %v381_v6 = vld [vmem:[#allocation7 + $0x20] sm:$0xff]  ;;  %v380_v7 = vld [vmem:[#allocation7 + $0x18] sm:$0xff]  ;;  %v379_v8 = vld [vmem:[#allocation7 + $0x10] sm:$0xff] }
  0x18   :  { %v378_v9 = vld [vmem:[#allocation7 + $0x8] sm:$0xff]  ;;  %v377_v10 = vld [vmem:[#allocation7] sm:$0xff]  ;;  %v392_v11 = vld [vmem:[#allocation9 + $0x38] sm:$0xff] }
  0x19   :  { %311 = vmatmul.msk.bf16.vlgmr.msra.gmra.mxu0 %vm115_vm0, %v102_v3  ;;  %285 = vmatpush.bf16.msra.mxu2 %v392_v11  ;;  %v391_v12 = vld [vmem:[#allocation9 + $0x30] sm:$0xff]  ;;  %v390_v13 = vld [vmem:[#allocation9 + $0x28] sm:$0xff]  ;;  %v389_v14 = vld [vmem:[#allocation9 + $0x20] sm:$0xff] }
  0x1a   :  { %v388_v15 = vld [vmem:[#allocation9 + $0x18] sm:$0xff]  ;;  %v387_v16 = vld [vmem:[#allocation9 + $0x10] sm:$0xff]  ;;  %v386_v23 = vld [vmem:[#allocation9 + $0x8] sm:$0xff] }
  0x1b   :  { %203 = vmatpush.bf16.msra.mxu1 %v383_v4  ;;  %v400_v17 = vld [vmem:[#allocation6] ss:$0 sm:$0xff]  ;;  %v385_v24 = vld [vmem:[#allocation9] sm:$0xff]  ;;  %v401_v25 = vld [vmem:[%s604_s4] ss:$0 sm:$0xff] }
  0x1c   :  { %v402_v31 = vld [vmem:[%s606_s6] ss:$0 sm:$0xff] }
  0x1d   :  { %286 = vmatpush.bf16.msra.mxu2 %v391_v12 }
  0x1f   :  { %204 = vmatpush.bf16.msra.mxu1 %v382_v5 }
  0x21   :  { %287 = vmatpush.bf16.msra.mxu2 %v390_v13 }
  0x23   :  { %205 = vmatpush.bf16.msra.mxu1 %v381_v6 }
  0x25   :  { %288 = vmatpush.bf16.msra.mxu2 %v389_v14 }
  0x27   :  { %206 = vmatpush.bf16.msra.mxu1 %v380_v7 }
  0x29   :  { %289 = vmatpush.bf16.msra.mxu2 %v388_v15 }
  0x2b   :  { %207 = vmatpush.bf16.msra.mxu1 %v379_v8 }
  0x2d   :  { %290 = vmatpush.bf16.msra.mxu2 %v387_v16 }
  0x2f   :  { %208 = vmatpush.bf16.msra.mxu1 %v378_v9 }
  0x31   :  { %291 = vmatpush.bf16.msra.mxu2 %v386_v23 }
  0x33   :  { %209 = vmatpush.bf16.msra.mxu1 %v377_v10 }
  0x35   :  { %292 = vmatpush.bf16.msra.mxu2 %v385_v24 }
  0x96   :  { %v128_v18 = vpop.f32.mrf.mxu0 }
  0x97   :  { %v129_v19 = vadd.f32 %v400_v17, %v128_v18 }
  0x99   :  { %v132_v20 = vmax.f32 %v129_v19, 0.0 }
  0x9b   :  { %v133_v21 = vpack.c.bf16 %v132_v20, %v132_v20 }
  0x9d   :  { %210 = vmatmul.bf16.vlgmr.msra.gmra.mxu1 %v133_v21 }
  0x9e   :  { %v130_v22 = vpop.f32.mrf.mxu0 }
 0x11a   :  { %v211_v26 = vpop.f32.mrf.mxu1 }
 0x11b   :  { %v212_v27 = vadd.f32 %v401_v25, %v211_v26 }
 0x11d   :  { %v215_v28 = vmax.f32 %v212_v27, 0.0 }
 0x11f   :  { %v216_v29 = vpack.c.bf16 %v215_v28, %v215_v28 }
 0x121   :  { %293 = vmatmul.bf16.vlgmr.msra.gmra.mxu2 %v216_v29 }
 0x122   :  { %v213_v30 = vpop.f32.mrf.mxu1 }
 0x1a4   :  { %v294_v32 = vpop.f32.mrf.mxu2 }
 0x1a5   :  { %v295_v33 = vadd.f32 %v402_v31, %v294_v32 }
 0x1a7   :  { %v298_v34 = vpack.c.bf16 %v295_v33, %v295_v33 }
 0x1a9   :  { %299 = vst [vmem:[%s607_s7] sm:$0xf] %v298_v34 }
 0x1ac   :  { %v296_v35 = vpop.f32.mrf.mxu2 }
 0x1ad   :  { %304 = vsyncpa [#allocation3], 1 }
 0x1ae   :  { %305 = vsyncpa [#allocation5], 1 }
 0x1af   :  { %306 = vsyncpa [#allocation8], 1 }

</bundles_post_ra>
